<compile_context>
chip_gen: v5e
topology: v5e:2x2
jax: 0.10.0
libtpu: 0.0.40
codegen_flags: <defaults>
</compile_context>

<pallas_src>
import jax
import jax.numpy as jnp
from jax.experimental import pallas as pl
from jax.experimental.pallas import tpu as pltpu


def _conv_bn_silu_kernel(pat_ref, w_ref, shift_ref, o_ref):
    # pat_ref: (1, Kdim, tile_s) bf16; w_ref: (C_out, Kdim) bf16; shift_ref: (C_out, 1) f32.
    pat = pat_ref[...][0]                        # (Kdim, tile_s); unit-dim squeeze is free
    # MXU: [C_out, Kdim] @ [Kdim, tile_s] with f32 accumulation.
    acc = jnp.dot(w_ref[...], pat, preferred_element_type=jnp.float32)
    # Folded conv-bias + BatchNorm(eval): per-output-channel shift (scale already folded
    # into the weight rows in the wrapper).
    acc = acc + shift_ref[...]
    # SiLU: x * sigmoid(x)  (sigmoid rides the EUP slot; epilogue stays f32).
    acc = acc * jax.nn.sigmoid(acc)
    # Dropout (eval mode) = identity.
    o_ref[...] = acc[None].astype(o_ref.dtype)   # lane-dense (C_out, tile_s) store


def _round_up(x, m):
    return ((x + m - 1) // m) * m


def _pick_tile(sp, max_tile=4096):
    # Largest multiple of 128 that divides sp (sp is already a multiple of 128) and is
    # <= max_tile, so there is no extra padding waste from the tiling itself.
    best = 128
    for cand in range(min(max_tile, sp), 127, -128):
        if sp % cand == 0:
            best = cand
            break
    return best


def my_conv2d_forward(x, w, b, gamma, beta, running_mean, running_var,
                      *, stride=2, padding=1, eps=1e-5):
    """x: [N, C_in, H, W] float32 (NCHW). Returns [N, C_out, H_out, W_out] float32."""
    N, C_in, H, W = x.shape
    C_out, _, K, _ = w.shape
    H_out = (H + 2 * padding - K) // stride + 1
    W_out = (W + 2 * padding - K) // stride + 1
    Kdim = C_in * K * K
    S = H_out * W_out

    # ---- im2col glue, all in bf16 and already in [N, Kdim, S] (row = c*K*K + kh*K + kw,
    # matching the PyTorch weight flattening); contiguous-dim merges only, no transposes. ----
    xp = jnp.pad(x.astype(jnp.bfloat16),
                 ((0, 0), (0, 0), (padding, padding), (padding, padding)))
    taps = []
    for kh in range(K):
        for kw in range(K):
            taps.append(xp[:, :, kh:kh + stride * H_out:stride,
                               kw:kw + stride * W_out:stride])    # [N, C_in, H_out, W_out]
    pat = jnp.stack(taps, axis=2)                                 # [N, C_in, K*K, H_out, W_out]
    pat = pat.reshape(N, Kdim, S)                                 # [N, Kdim, H_out*W_out]

    # ---- spatial (lane) tiling: big tiles, multiple of 128. ----
    Sp = _round_up(S, 128)
    tile_s = _pick_tile(Sp)
    if N == 1 and Sp // tile_s == 1 and Sp >= 256 and (Sp // 2) % 128 == 0:
        tile_s = Sp // 2          # keep >= 2 grid steps so both v7x TensorCores get work
    if Sp != S:
        pat = jnp.pad(pat, ((0, 0), (0, 0), (0, Sp - S)))

    # ---- fold conv bias + BatchNorm(eval) into scale/shift; fold scale into the weights. ----
    scale = gamma * jax.lax.rsqrt(running_var + eps)              # [C_out]
    shift = (b - running_mean) * scale + beta                     # [C_out]
    w_mat = (w.reshape(C_out, Kdim) * scale[:, None]).astype(jnp.bfloat16)
    shift_f32 = shift.reshape(C_out, 1).astype(jnp.float32)

    grid = (N, Sp // tile_s)
    cost = pl.CostEstimate(
        flops=2 * N * Sp * Kdim * C_out,
        transcendentals=N * Sp * C_out,
        bytes_accessed=(N * Kdim * Sp * 2 + C_out * Kdim * 2
                        + C_out * 4 + N * C_out * Sp * 4),
    )

    out = pl.pallas_call(
        _conv_bn_silu_kernel,
        out_shape=jax.ShapeDtypeStruct((N, C_out, Sp), jnp.float32),
        grid_spec=pltpu.PrefetchScalarGridSpec(
            num_scalar_prefetch=0,
            grid=grid,
            in_specs=[
                # Streamed, lane-dense patch tile.  If DMA is still exposed after the
                # bigger tiles, pipeline_mode=pl.Buffered(3) here is the next knob.
                pl.BlockSpec((1, Kdim, tile_s), lambda n, s: (n, 0, s)),
                # Grid-invariant constants (same block every step).
                pl.BlockSpec((C_out, Kdim), lambda n, s: (0, 0)),
                pl.BlockSpec((C_out, 1), lambda n, s: (0, 0)),
            ],
            out_specs=pl.BlockSpec((1, C_out, tile_s), lambda n, s: (n, 0, s)),
        ),
        compiler_params=pltpu.CompilerParams(
            dimension_semantics=("parallel", "parallel")),
        cost_estimate=cost,
    )(pat, w_mat, shift_f32)

    # N-major output: drop lane padding (no-op when Sp == S); NCHW is then a pure reshape.
    return out[:, :, :S].reshape(N, C_out, H_out, W_out)


if __name__ == "__main__":
    key = jax.random.PRNGKey(0)
    k_x, k_w, k_b = jax.random.split(key, 3)

    # Small shapes consistent with the module: batch=2, in_ch=4, out_ch=8, spatial=16.
    N, C_in, C_out, H, W, K = 2, 4, 8, 16, 16, 3

    x = jax.random.normal(k_x, (N, C_in, H, W), dtype=jnp.float32)
    w = jax.random.normal(k_w, (C_out, C_in, K, K), dtype=jnp.float32) * 0.1
    b = jax.random.normal(k_b, (C_out,), dtype=jnp.float32) * 0.1

    # BatchNorm2d parameters at PyTorch defaults (eval mode): gamma=1, beta=0,
    # running_mean=0, running_var=1.
    gamma = jnp.ones((C_out,), jnp.float32)
    beta = jnp.zeros((C_out,), jnp.float32)
    running_mean = jnp.zeros((C_out,), jnp.float32)
    running_var = jnp.ones((C_out,), jnp.float32)

    y = my_conv2d_forward(x, w, b, gamma, beta, running_mean, running_var)
    y = jax.block_until_ready(y)
    assert y.shape == (N, C_out, H // 2, W // 2), y.shape
    print("KERNEL_OK")
</pallas_src>

<mosaic_0001>
module attributes {stable_mosaic.version = 11 : i64} {
  func.func @_conv_bn_silu_kernel(%arg0: i32, %arg1: i32, %arg2: memref<1x36x128xbf16, #tpu.memory_space<vmem>>, %arg3: memref<8x36xbf16, #tpu.memory_space<vmem>>, %arg4: memref<8x1xf32, #tpu.memory_space<vmem>>, %arg5: memref<1x8x128xf32, #tpu.memory_space<vmem>>) attributes {dimension_semantics = [#tpu.dimension_semantics<parallel>, #tpu.dimension_semantics<parallel>], iteration_bounds = array<i64: 2, 1>, scalar_prefetch = 0 : i64, scratch_operands = 0 : i64, tpu.core_type = #tpu.core_type<tc>, window_params = [{transform_indices = @transform_0, window_bounds = array<i64: 1, 36, 128>}, {pipeline_mode = #tpu.pipeline_mode<synchronous>, transform_indices = @transform_1, window_bounds = array<i64: 8, 36>}, {pipeline_mode = #tpu.pipeline_mode<synchronous>, transform_indices = @transform_2, window_bounds = array<i64: 8, 1>}, {transform_indices = @transform_3, window_bounds = array<i64: 1, 8, 128>}]} {
    %c0 = arith.constant 0 : index
    %c0_0 = arith.constant 0 : index
    %c0_1 = arith.constant 0 : index
    %0 = vector.load %arg2[%c0, %c0_0, %c0_1] : memref<1x36x128xbf16, #tpu.memory_space<vmem>>, vector<1x36x128xbf16>
    %1 = vector.shape_cast %0 : vector<1x36x128xbf16> to vector<36x128xbf16>
    %c0_2 = arith.constant 0 : index
    %c0_3 = arith.constant 0 : index
    %2 = vector.load %arg3[%c0_2, %c0_3] : memref<8x36xbf16, #tpu.memory_space<vmem>>, vector<8x36xbf16>
    %cst = arith.constant dense<0.000000e+00> : vector<8x128xf32>
    %3 = tpu.matmul %2, %1, %cst {dimension_numbers = #tpu.dot_dimension_numbers<[1], [0], [0], [1], [0, 0, 1, 1], [], []>} : vector<8x36xbf16>, vector<36x128xbf16>, vector<8x128xf32> -> vector<8x128xf32>
    %c0_4 = arith.constant 0 : index
    %c0_5 = arith.constant 0 : index
    %4 = vector.load %arg4[%c0_4, %c0_5] : memref<8x1xf32, #tpu.memory_space<vmem>>, vector<8x1xf32>
    %5 = vector.broadcast %4 : vector<8x1xf32> to vector<8x128xf32>
    %6 = arith.addf %3, %5 : vector<8x128xf32>
    %7 = arith.negf %6 : vector<8x128xf32>
    %8 = math.exp %7 : vector<8x128xf32>
    %cst_6 = arith.constant 1.000000e+00 : f32
    %9 = vector.broadcast %cst_6 : f32 to vector<8x128xf32>
    %10 = arith.addf %9, %8 : vector<8x128xf32>
    %11 = arith.divf %9, %10 : vector<8x128xf32>
    %12 = arith.mulf %6, %11 : vector<8x128xf32>
    %13 = vector.shape_cast %12 : vector<8x128xf32> to vector<1x8x128xf32>
    %c0_7 = arith.constant 0 : index
    %c0_8 = arith.constant 0 : index
    %c0_9 = arith.constant 0 : index
    %14 = vector.load %arg5[%c0_7, %c0_8, %c0_9] : memref<1x8x128xf32, #tpu.memory_space<vmem>>, vector<1x8x128xf32>
    tpu.vector_store %arg5[%c0_7, %c0_8, %c0_9], %13 {strides = array<i32>} : memref<1x8x128xf32, #tpu.memory_space<vmem>>, vector<1x8x128xf32>,
    return
  }
  func.func @transform_0(%arg0: i32, %arg1: i32) -> (i32, i32, i32) {
    %c0_i32 = arith.constant 0 : i32
    %c0_i32_0 = arith.constant 0 : i32
    return %arg0, %c0_i32, %arg1 : i32, i32, i32
  }
  func.func @transform_1(%arg0: i32, %arg1: i32) -> (i32, i32) {
    %c0_i32 = arith.constant 0 : i32
    %c0_i32_0 = arith.constant 0 : i32
    %c0_i32_1 = arith.constant 0 : i32
    return %c0_i32, %c0_i32_0 : i32, i32
  }
  func.func @transform_2(%arg0: i32, %arg1: i32) -> (i32, i32) {
    %c0_i32 = arith.constant 0 : i32
    %c0_i32_0 = arith.constant 0 : i32
    %c0_i32_1 = arith.constant 0 : i32
    return %c0_i32, %c0_i32_0 : i32, i32
  }
  func.func @transform_3(%arg0: i32, %arg1: i32) -> (i32, i32, i32) {
    %c0_i32 = arith.constant 0 : i32
    %c0_i32_0 = arith.constant 0 : i32
    return %arg0, %c0_i32, %arg1 : i32, i32, i32
  }
}

</mosaic_0001>

<bundles_post_ra>
// kernel: tpu_custom_call.1
= control target key start
LH: loop header
LB: loop body
LE: loop exit
PB: predicated region body
PF: predicated region fallthrough
CT: control target
= control target key end

     0   :  { %8 = vsyncpa [#allocation3], 0  ;;  %s644_s0 = inlined_call_operand.vmem [shape: bf16[2,36,128], index: 0, kind: input, shape index: {}]   ;;  %s645_s1 = inlined_call_operand.vmem [shape: bf16[8,36], index: 1, kind: input, shape index: {}]   ;;  %s646_s2 = inlined_call_operand.vmem [shape: f32[8,1], index: 2, kind: input, shape index: {}]   ;;  %s647_s3 = inlined_call_operand.hbm [shape: f32[2,8,128], index: 3, kind: output, shape index: {}]  }
   0x1   :  { %10 = vsyncpa [#allocation3 + $0x1], 0  ;;  %s541_s12 = smov 0   ;;  %s543_s13 = smov 0  }
   0x2   :  { %s545_s14 = smov 0   ;;  %s547_s15 = smov 0  }
   0x3   :  { %s549_s16 = smov 0   ;;  %s551_s17 = smov 0  }
   0x4 LB: > { %s355_s18 = sadd.s32 4294967295, %s518_s17   ;;  %s356_s19 = sadd.s32 4294967294, %s518_s17   ;;  %s518_s17 = sphi %s551_s17, %s16_s17   ;;  %s514_s16 = sphi %s549_s16, %s654_s16   ;;  %s510_s15 = sphi %s547_s15, %s653_s15   ;;  %s506_s14 = sphi %s545_s14, %s652_s14   ;;  %s502_s13 = sphi %s543_s13, %s651_s13   ;;  %s498_s12 = sphi %s541_s12, %s650_s12  }
   0x5   : > { %s28_s20 = sadd.s32 1, %s514_s16  ;;  %s107_s21 = sadd.s32 1, %s506_s14 }
   0x6   : > { %p30_p0 = scmp.ge.s32.totalorder %s28_s20, 2  ;;  %p117_p1 = scmp.ne.s32.totalorder %s506_s14, %s502_s13 }
   0x7   : > { %p118_p2 = scmp.eq.s32.totalorder %s355_s18, 1  ;;  %p123_p3 = scmp.ne.s32.totalorder %s502_s13, %s498_s12 }
   0x8   : > { %s656_s20 = smov (%p30_p0, %s28_s20), 0  ;;  %p124_p5 = scmp.eq.s32.totalorder %s356_s19, 1 }
   0x9   : > { %p581_p4 = por %p118_p2, %p117_p1  ;;  %s102_s23 = ssub.s32 %s514_s16, %s656_s20 }
   0xa   : > { %p359_p6 = scmp.ge.s32.totalorder %s518_s17, 1  ;;  %p105_p7 = scmp.eq.s32.totalorder %s102_s23, 0 }
   0xb   : > { %p588_p8 = por %p124_p5, %p123_p3  ;;  %p159_p9 = scmp.lt.s32.totalorder %s518_s17, 3 }
   0xc   : > { %s594_s25 = scalar_select %p105_p7, %s506_s14, %s107_s21  }
   0xd   : > { %p160_p10 = pnand %p359_p6, %p159_p9 }
   0xe   : > { %p186_p11 = scmp.lt.s32.totalorder (!%p160_p10), %s510_s15, 1  ;;  %s183_s8 = sand.u32 (!%p160_p10), 1, %s502_s13  }
   0xf   : > { %163 = sbr.rel (%p160_p10) target bundleno = 203 (0xcb), region = 32  ;;  %s360_s9 = sshll.u32 (!%p160_p10), %s183_s8, 3 }
  0x10   : > { %s373_s10 = sshll.u32 (!%p160_p10), %s510_s15, 3  ;;  %s185_s21 = scalar_lea.vmem (!%p160_p10), [#allocation2], %s360_s9 }
  0x11   : > { %s276_s19 = scalar_lea.hbm (!%p160_p10), %s647_s3, %s373_s10  ;;  %s278_s23 = sshll.u32 (!%p160_p10), %s185_s21, 4  ;;  %s279_s23 = int_to_ptr.vmem [resolvable:$true] %s278_s23 }
  0x12   : > { %s280_s26 = sshll.u32 (!%p160_p10), %s276_s19, 4  ;;  %s460_s4 = scalar_lea.hbm (!%p160_p10), %s647_s3, 16  ;;  %s281_s26 = int_to_ptr.hbm [resolvable:$true] %s280_s26 }
  0x13   : > { %s454_s27 = sshra.s32 (!%p160_p10), %s281_s26, 4  ;;  %s455_s27 = int_to_ptr.hbm [resolvable:$true] %s454_s27 }
  0x14   : > { %v520_v0 = vmov 0   ;;  %v201_v1 = vld [vmem:[%s646_s2] sm:$0xff]  ;;  %s187_s28 = scalar_select %p186_p11, %s510_s15, 1  ;;  %vm226_vm0 = vcmask 1041408   ;;  %vm222_vm1 = vcmask 293888  }
  0x15   : > { %435 = vset.pattern.permute.xlu0 %v520_v0  ;;  %v200_v8 = vld [vmem:[%s645_s1] sm:$0xf]  ;;  %s265_s15 = scalar_lea.sflag [#allocation3], %s183_s8  ;;  %p461_p1 = scmp.lt.s32.totalorder %s455_s27, %s647_s3 }
  0x16   : > { %204 = vperm.xlu0 %435, %v201_v1   ;;  %s378_s29 = smul.u32 20, %s187_s28  ;;  %s456_s28 = scalar_lea.hbm %s455_s27, 8 }
  0x17   : > { %p457_p12 = scmp.ne.s32.totalorder %s455_s27, %s456_s28  ;;  %p462_p2 = scmp.lt.s32.totalorder %s460_s4, %s456_s28 }
  0x18   : > { %s193_s5 = scalar_lea.vmem %s644_s0, %s378_s29 }
  0x19   : > { %v199_v2 = vld [vmem:[%s193_s5 + $0x10] sm:$0x3]  ;;  %v377_v6 = vld [vmem:[%s193_s5 + $0x8] sm:$0xff]  ;;  %v376_v7 = vld [vmem:[%s193_s5] sm:$0xff]  ;;  %p458_p13 = pnand %p457_p12, %p581_p4  ;;  %p463_p3 = por %p462_p2, %p461_p1 }
  0x1a   : > { %v216_v3 = vunpack.c.l.b16 %v199_v2 }
  0x1b   : > { %p459_p0 = pneg %p458_p13 }
  0x1c   : > { %v219_v4 = vpack.c.b16 %v216_v3, %v216_v3 }
  0x1d   : > { %p464_p5 = pnand %p463_p3, %p459_p0 }
  0x1e   : > { %v228_v5 = vsel %vm226_vm0, %v219_v4, 0 }
  0x1f   : > { %235 = vmatpush.bf16.msra.mxu0 %v228_v5 }
  0x23   : > { %236 = vmatpush.bf16.msra.mxu0 %v377_v6 }
  0x27   : > { %237 = vmatpush.bf16.msra.mxu0 %v376_v7 }
  0x2a   : > { %370 = vmatmul.msk.bf16.vlgmr.msra.gmra.mxu0 %vm222_vm1, %v200_v8 }
  0x88   : > { %v205_v9 = vpop.permute.xlu0 %204 }
  0xa7   : > { %v239_v10 = vpop.f32.mrf.mxu0 }
  0xa8   : > { %v240_v11 = vadd.f32 %v239_v10, %v205_v9 }
  0xaa   : > { %v371_v12 = vmul.f32 -1.442695, %v240_v11 }
  0xac   : > { %436 = vpow2.f32 %v371_v12 }
  0xaf   : > { %v241_v13 = vpop.f32.mrf.mxu0 }
  0xb2   : > { %v437_v14 = vpop.eup %436 }
  0xb3   : > { %v246_v15 = vadd.f32 1.0, %v437_v14 }
  0xb5   : > { %438 = vrcp.f32 %v246_v15  ;;  %v258_v19 = vand.u32 2147483648, %v246_v15  ;;  %v256_v21 = vand.u32 2147483647, %v246_v15  ;;  %vm252_vm3 = vweird.f32 %v246_v15 }
  0xb7   : > { %v259_v23 = vor.u32 1.1754944e-38, %v258_v19  ;;  %vm257_vm5 = vcmp.eq.f32.partialorder %v256_v21, 8.507059e+37 }
  0xbb   : > { %v439_v16 = vpop.eup %438 }
  0xbc   : > { %v248_v17 = vmul.f32 %v439_v16, %v246_v15  ;;  %vm253_vm2 = vweird.f32 %v439_v16 }
  0xbd   : > { %vm254_vm4 = vmor %vm252_vm3, %vm253_vm2 }
  0xbe   : > { %v249_v18 = vsub.f32 1.0, %v248_v17 }
  0xc0   : > { %v250_v20 = vmul.f32 %v439_v16, %v249_v18 }
  0xc2   : > { %v251_v22 = vadd.f32 %v439_v16, %v250_v20 }
  0xc4   : > { %v255_v24 = vsel %vm254_vm4, %v439_v16, %v251_v22 }
  0xc5   : > { %v260_v25 = vsel %vm257_vm5, %v259_v23, %v255_v24 }
  0xc6   : > { %v262_v26 = vmul.f32 %v260_v25, %v240_v11 }
  0xc8   : > { %263 = vst [vmem:[%s185_s21] sm:$0xff] %v262_v26 }
  0xc9   : > { %467 = shalt.err (!%p464_p5)
}
  0xca   : > { %379 = dma.vmem_to_hbm [thread:$0]  (%p581_p4), %s279_s23, 128, %s281_s26, %s265_s15  }
  0xcb PF: > { %p385_p6 = scmp.ge.s32.totalorder %s518_s17, 2  ;;  %s292_s7 = sand.u32 1, %s498_s12  }
  0xcc   : > { %s293_s8 = scalar_lea.sflag [#allocation3], %s292_s7 }
  0xcd   : > { %p382_p7 = pnand %p385_p6, %p588_p8 }
  0xcf   : > { %p383_p9 = pneg %p382_p7 }
  0xd1   : > { %493 = dma.done.wait (%p383_p9), %s293_s8, 128  }
  0xd2   : > { %495 = vsyncadd (%p383_p9), %s293_s8, 4294967168  ;;  %s16_s17 = sadd.s32 1, %s518_s17   ;;  %s650_s12 = smov %s502_s13 }
  0xd3   : > { %p13_p10 = scmp.ge.s32.totalorder %s16_s17, 4   ;;  %s651_s13 = smov %s506_s14 }
  0xd4   : > { %s652_s14 = smov %s594_s25  ;;  %s653_s15 = smov %s514_s16 }
  0xd5   : > { %s654_s16 = smov %s656_s20  ;;  %15 = sbr.rel (!%p13_p10) target bundleno = 4 (0x4), region = 67 }
  0xda   :  { %299 = vsyncpa [#allocation3], 1 }
  0xdb   :  { %301 = vsyncpa [#allocation3 + $0x1], 1 }

</bundles_post_ra>
